<compile_context>
chip_gen: v7x
topology: tpu7x:2x2x1
jax: 0.10.0
libtpu: 0.0.40
codegen_flags: <defaults>
</compile_context>

<pallas_src>
import functools

import jax
import jax.numpy as jnp
from jax import lax
from jax.experimental import pallas as pl
from jax.experimental.pallas import tpu as pltpu


_VMEM_LIMIT_BYTES = 32 * 1024 * 1024   # explicit scoped-VMEM limit (safe on all gens)


# ---------------------------------------------------------------------------
# Phase 1: fold the Linear into the embedding table:  proj[v] = emb[v] @ W^T
# ---------------------------------------------------------------------------
def _project_kernel(emb_ref, w_ref, proj_ref):
    # No upcast of the streamed table tile: the MXU takes bf16 natively and
    # f32 works too; accumulation is forced to f32 via preferred_element_type.
    proj_ref[...] = jnp.dot(emb_ref[...], w_ref[...],
                            preferred_element_type=jnp.float32)


def _choose_tile_v(V, D, itemsize, target_bytes=2 * 1024 * 1024):
    """Size the V-tile by bytes (~2 MiB input block), multiple of 8 rows."""
    rows = target_bytes // max(1, D * itemsize)
    if rows >= V:
        return V                      # full array dim -> always layout-legal
    return max(8, int(rows) // 8 * 8)


def _project_table(emb_table, w_t):
    V, D = emb_table.shape
    C = w_t.shape[1]
    tv = _choose_tile_v(V, D, emb_table.dtype.itemsize)
    return pl.pallas_call(
        _project_kernel,
        out_shape=jax.ShapeDtypeStruct((V, C), jnp.float32),
        grid_spec=pltpu.PrefetchScalarGridSpec(
            num_scalar_prefetch=0,
            grid=(pl.cdiv(V, tv),),
            in_specs=[
                pl.BlockSpec((tv, D), lambda i: (i, 0)),   # stream table rows
                pl.BlockSpec((D, C), lambda i: (0, 0)),    # tiny weight, resident
            ],
            out_specs=pl.BlockSpec((tv, C), lambda i: (i, 0)),
        ),
        compiler_params=pltpu.CompilerParams(
            dimension_semantics=("parallel",),
            vmem_limit_bytes=_VMEM_LIMIT_BYTES),
    )(emb_table, w_t)


# ---------------------------------------------------------------------------
# Phase 2: gather + BoW sum + bias + log_softmax over a batch tile.
# ---------------------------------------------------------------------------
def _bow_kernel(ids_ref, proj_ref, bias_ref, out_ref, row_scratch, *,
                S, B, unroll_cap):
    # ids_ref    : SMEM [B*S] int32   (scalar-prefetched token ids)
    # proj_ref   : VMEM [V, C] f32    (embedding table already folded with W^T)
    # bias_ref   : VMEM [1, C] f32
    # out_ref    : VMEM [TB, C] f32   (this grid step's batch tile)
    # row_scratch: VMEM [TB, C] f32
    TB, C = out_ref.shape
    bi = pl.program_id(0)

    n_pairs = S // 2                 # static
    has_tail = (S % 2) == 1          # static
    unroll = max(1, min(unroll_cap, max(n_pairs, 1)))

    def gather(tok):                 # [1, C] dynamic-sublane row gather
        return proj_ref[pl.ds(tok, 1), :].astype(jnp.float32)

    @pl.loop(0, TB)
    def _(r):
        # Clamp handles the ragged final batch tile; the out-of-range rows are
        # dropped by Pallas when the partial output block is written back.
        b = jnp.minimum(bi * TB + r, B - 1)
        base = b * S

        row = jnp.zeros((1, C), jnp.float32)
        if n_pairs > 0:
            # Two independent accumulators hide the vld->vadd latency chain;
            # bounded unroll keeps vreg pressure under control for large S.
            def per_pair(p, accs):
                a0, a1 = accs
                a0 = a0 + gather(ids_ref[base + 2 * p])
                a1 = a1 + gather(ids_ref[base + 2 * p + 1])
                return a0, a1

            a0, a1 = lax.fori_loop(0, n_pairs, per_pair, (row, row),
                                   unroll=unroll)
            row = a0 + a1
        if has_tail:
            row = row + gather(ids_ref[base + S - 1])

        # Direct dynamic sublane store of the finished row (no masked-select
        # scatter over the whole [TB, C] tile).
        row_scratch[pl.ds(r, 1), :] = row

    # Bias + log_softmax + output store once per batch tile.
    logits = row_scratch[...] + bias_ref[...]
    m = jnp.max(logits, axis=-1, keepdims=True)
    shifted = logits - m
    lse = jnp.log(jnp.sum(jnp.exp(shifted), axis=-1, keepdims=True))
    out_ref[...] = shifted - lse


def bow_model_forward(token_ids, emb_table, linear_w, linear_b, *,
                      batch_tile=128, unroll_cap=4):
    """token_ids: [B, S] int, emb_table: [V, D], linear_w: [C, D], linear_b: [C]."""
    B, S = token_ids.shape
    V, D = emb_table.shape
    C = linear_w.shape[0]

    # Scalar-prefetched ids live in SMEM (1-D SMEM pads to a power of two), so
    # keep the total token count bounded; beyond this, tile ids through VMEM.
    assert B * S <= (1 << 16), "token-id array too large for SMEM prefetch"

    w_t = linear_w.T.astype(emb_table.dtype)                # [D, C] (match table dtype)
    bias2d = linear_b.reshape(1, C).astype(jnp.float32)     # [1, C]

    # One-shot projection (weights are frozen; in real use this is cached).
    # For very large vocabularies (esp. v7x / 64 MiB VMEM), store proj as bf16
    # and/or keep it in HBM with memory_space=pl.ANY plus a manual DMA gather.
    proj = _project_table(emb_table, w_t)                   # [V, C] f32

    ids_flat = token_ids.reshape(-1).astype(jnp.int32)      # [B*S] -> SMEM

    # Batch tile: either the full batch or a multiple of 8 (layout constraint).
    tb = B if B <= batch_tile else max(8, (batch_tile // 8) * 8)

    # Rough per-TensorCore VMEM residency check (proj double-buffered by the
    # auto pipeline + output + scratch); catches the VMEM cliff at sizing time.
    resident = 4 * (2 * V * C + 2 * tb * C + tb * C + 2 * C)
    assert resident < _VMEM_LIMIT_BYTES, "projected table does not fit in VMEM"

    kernel = functools.partial(_bow_kernel, S=S, B=B, unroll_cap=unroll_cap)

    return pl.pallas_call(
        kernel,
        out_shape=jax.ShapeDtypeStruct((B, C), jnp.float32),
        grid_spec=pltpu.PrefetchScalarGridSpec(
            num_scalar_prefetch=1,                            # ids -> SMEM
            grid=(pl.cdiv(B, tb),),
            in_specs=[
                pl.BlockSpec((V, C), lambda i, ids: (0, 0)),  # projected table
                pl.BlockSpec((1, C), lambda i, ids: (0, 0)),  # bias
            ],
            out_specs=pl.BlockSpec((tb, C), lambda i, ids: (i, 0)),
            scratch_shapes=[pltpu.VMEM((tb, C), jnp.float32)],
        ),
        compiler_params=pltpu.CompilerParams(
            dimension_semantics=("parallel",),
            vmem_limit_bytes=_VMEM_LIMIT_BYTES),
    )(ids_flat, proj, bias2d)


def _reference(token_ids, emb_table, linear_w, linear_b):
    embedded = emb_table[token_ids]                 # [B, S, D]
    bow = embedded.sum(axis=1)                      # [B, D]
    logits = bow @ linear_w.T + linear_b            # [B, C]
    return jax.nn.log_softmax(logits, axis=-1)


if __name__ == "__main__":
    key = jax.random.PRNGKey(0)
    k_emb, k_w, k_b, k_ids, k_ids2 = jax.random.split(key, 5)

    # small shapes consistent with the module
    V, D = 32, 16          # vocab size, embedding dim
    B, S = 2, 8            # batch, sentence length
    C = 2                  # output classes

    emb_table = jax.random.normal(k_emb, (V, D), dtype=jnp.float32)
    # nn.Embedding(padding_idx=0): forward uses whatever row 0 holds after the
    # weight is replaced; zero it here to mimic the typical padding row.
    emb_table = emb_table.at[0].set(0.0)

    bound = 1.0 / jnp.sqrt(D)
    linear_w = jax.random.uniform(k_w, (C, D), minval=-bound, maxval=bound,
                                  dtype=jnp.float32)
    linear_b = jax.random.uniform(k_b, (C,), minval=-bound, maxval=bound,
                                  dtype=jnp.float32)

    token_ids = jax.random.randint(k_ids, (B, S), 0, V, dtype=jnp.int32)

    out = bow_model_forward(token_ids, emb_table, linear_w, linear_b)
    out = jax.block_until_ready(out)
    ref = _reference(token_ids, emb_table, linear_w, linear_b)
    assert out.shape == (B, C)
    # Only accumulation order differs from the reference (Linear folded before
    # the BoW sum), so a tight tolerance holds.
    assert jnp.allclose(out, ref, atol=1e-4, rtol=1e-4), (out, ref)

    # Ragged final batch tile check (B % batch_tile != 0): 10 examples, tile 8.
    B2 = 10
    token_ids2 = jax.random.randint(k_ids2, (B2, S), 0, V, dtype=jnp.int32)
    out2 = jax.block_until_ready(
        bow_model_forward(token_ids2, emb_table, linear_w, linear_b, batch_tile=8))
    ref2 = _reference(token_ids2, emb_table, linear_w, linear_b)
    assert out2.shape == (B2, C)
    assert jnp.allclose(out2, ref2, atol=1e-4, rtol=1e-4), (out2, ref2)

    print("KERNEL_OK")
</pallas_src>

<mosaic_0001>
module attributes {stable_mosaic.version = 11 : i64} {
  func.func @_project_kernel(%arg0: i32, %arg1: memref<32x16xf32, #tpu.memory_space<vmem>>, %arg2: memref<16x2xf32, #tpu.memory_space<vmem>>, %arg3: memref<32x2xf32, #tpu.memory_space<vmem>>) attributes {dimension_semantics = [#tpu.dimension_semantics<parallel>], iteration_bounds = array<i64: 1>, scalar_prefetch = 0 : i64, scratch_operands = 0 : i64, tpu.core_type = #tpu.core_type<tc>, window_params = [{transform_indices = @transform_0, window_bounds = array<i64: 32, 16>}, {pipeline_mode = #tpu.pipeline_mode<synchronous>, transform_indices = @transform_1, window_bounds = array<i64: 16, 2>}, {transform_indices = @transform_2, window_bounds = array<i64: 32, 2>}]} {
    %c0 = arith.constant 0 : index
    %c0_0 = arith.constant 0 : index
    %0 = vector.load %arg1[%c0, %c0_0] : memref<32x16xf32, #tpu.memory_space<vmem>>, vector<32x16xf32>
    %c0_1 = arith.constant 0 : index
    %c0_2 = arith.constant 0 : index
    %1 = vector.load %arg2[%c0_1, %c0_2] : memref<16x2xf32, #tpu.memory_space<vmem>>, vector<16x2xf32>
    %cst = arith.constant dense<0.000000e+00> : vector<32x2xf32>
    %2 = tpu.matmul %0, %1, %cst {dimension_numbers = #tpu.dot_dimension_numbers<[1], [0], [0], [1], [0, 0, 1, 1], [], []>} : vector<32x16xf32>, vector<16x2xf32>, vector<32x2xf32> -> vector<32x2xf32>
    %c0_3 = arith.constant 0 : index
    %c0_4 = arith.constant 0 : index
    %3 = vector.load %arg3[%c0_3, %c0_4] : memref<32x2xf32, #tpu.memory_space<vmem>>, vector<32x2xf32>
    tpu.vector_store %arg3[%c0_3, %c0_4], %2 {strides = array<i32>} : memref<32x2xf32, #tpu.memory_space<vmem>>, vector<32x2xf32>,
    return
  }
  func.func @transform_0(%arg0: i32) -> (i32, i32) {
    %c0_i32 = arith.constant 0 : i32
    %c0_i32_0 = arith.constant 0 : i32
    return %arg0, %c0_i32 : i32, i32
  }
  func.func @transform_1(%arg0: i32) -> (i32, i32) {
    %c0_i32 = arith.constant 0 : i32
    %c0_i32_0 = arith.constant 0 : i32
    %c0_i32_1 = arith.constant 0 : i32
    return %c0_i32, %c0_i32_0 : i32, i32
  }
  func.func @transform_2(%arg0: i32) -> (i32, i32) {
    %c0_i32 = arith.constant 0 : i32
    %c0_i32_0 = arith.constant 0 : i32
    return %arg0, %c0_i32 : i32, i32
  }
}

</mosaic_0001>

<bundles_post_ra>
// kernel: tpu_custom_call.1
= control target key start
LH: loop header
LB: loop body
LE: loop exit
PB: predicated region body
PF: predicated region fallthrough
CT: control target
= control target key end

     0   :  { %vm17_vm0 = vcmask 130048   ;;  %vm115_vm1 = vcmask 15360   ;;  %s195_s1 = inlined_call_operand.vmem [shape: f32[16,2], index: 1, kind: input, shape index: {}]   ;;  %s196_s0 = inlined_call_operand.vmem [shape: f32[32,16], index: 0, kind: input, shape index: {}]   ;;  %s197_s2 = inlined_call_operand.vmem [shape: f32[32,2], index: 2, kind: output, shape index: {}]  }
   0x1   :  { %v15_v0 = vld [vmem:[%s195_s1] sm:$0xff]  ;;  %v16_v1 = vld [vmem:[%s195_s1 + $0x8] sm:$0xff]  ;;  %v13_v4 = vld [vmem:[%s196_s0 + $0x10] sm:$0xff] }
   0x2   :  { %v11_v2 = vld [vmem:[%s196_s0] sm:$0xff]  ;;  %v144_v3 = vpack.c.bf16 %v16_v1, %v15_v0  ;;  %141 = vmatprep.mubr.msk.f32.mxu1 %vm17_vm0, %v13_v4  ;;  %v12_v5 = vld [vmem:[%s196_s0 + $0x8] sm:$0xff]  ;;  %v14_v6 = vld [vmem:[%s196_s0 + $0x18] sm:$0xff] }
   0x3   :  { %138 = vmatprep.mubr.msk.f32.mxu0 %vm17_vm0, %v11_v2 }
   0x4   :  { %145 = vmatprep.subr.bf16.mxu0 %v144_v3  ;;  %148 = vmatprep.subr.bf16.mxu1 %v144_v3 }
   0x5   :  { %147 = vmatpush3.bf16.msra.mxu0 %v144_v3  ;;  %149 = vmatpush3.bf16.msra.mxu1 %v144_v3 }
   0x8   :  { %139 = vmatmul.mubr.msk.f32.vlgmr.msra.gmra.mrb[0].mxu0 %vm17_vm0, %v12_v5  ;;  %142 = vmatmul.mubr.msk.f32.vlgmr.msra.gmra.mrb[0].mxu1 %vm17_vm0, %v14_v6 }
  0xdb   :  { %v140_v7 = vpop.f32.mrb[0].mxu0  ;;  %v143_v8 = vpop.f32.mrb[0].mxu1 }
  0xdc   :  { %117 = vst.msk [vmem:[%s197_s2 + $0x8] sm:$0xff] %vm115_vm1, %v140_v7  ;;  %119 = vst.msk [vmem:[%s197_s2 + $0x18] sm:$0xff] %vm115_vm1, %v143_v8  ;;  %v96_v9 = vpop.f32.mrb[1].mxu0  ;;  %v106_v10 = vpop.f32.mrb[1].mxu1 }
  0xdd   :  { %116 = vst.msk [vmem:[%s197_s2] sm:$0xff] %vm115_vm1, %v96_v9  ;;  %118 = vst.msk [vmem:[%s197_s2 + $0x10] sm:$0xff] %vm115_vm1, %v106_v10 }

</bundles_post_ra>
